<compile_context>
chip_gen: v7x
topology: tpu7x:2x2x1
jax: 0.10.0
libtpu: 0.0.40
codegen_flags: <defaults>
</compile_context>

<pallas_src>
import math
from functools import partial

import jax
import jax.numpy as jnp
from jax import lax
from jax.experimental import pallas as pl
from jax.experimental.pallas import tpu as pltpu


def _layer_norm(v, g, b, eps=1e-5):
    mean = jnp.mean(v, axis=-1, keepdims=True)
    var = jnp.mean((v - mean) ** 2, axis=-1, keepdims=True)
    return (v - mean) * lax.rsqrt(var + eps) * g + b


def _pick_tile(n, target):
    """Largest divisor of n that is <= target and a multiple of 8 (else n)."""
    if n <= target:
        return n
    for t in range(min(n, target), 0, -1):
        if n % t == 0 and t % 8 == 0:
            return t
    return n


# --------------------------------------------------------------------------
# Kernel 1: per-(batch, head) attention with fused QKV and q-tiling.
# --------------------------------------------------------------------------
def _attention_kernel(x_ref, wqkv_ref, bqkv_ref, *rest,
                      dk, tq, store_attn, approx_recip):
    if store_attn:
        ctx_ref, attn_ref, q_scr, k_scr, v_scr = rest
    else:
        ctx_ref, q_scr, v_scr = rest[0], rest[1], rest[3]
        k_scr = rest[2]
        attn_ref = None

    qi = pl.program_id(2)

    # Fused QKV projection for this (batch, head), computed once per head and
    # reused by every q-tile (MXU N = 3*dk; 1/sqrt(dk) folded into the Q part).
    @pl.when(qi == 0)
    def _():
        qkv = jnp.dot(x_ref[0], wqkv_ref[0],
                      preferred_element_type=jnp.float32) + bqkv_ref[0]
        qkv = qkv.astype(jnp.bfloat16)                        # (L, 3*dk)
        q_scr[...] = qkv[:, :dk]
        k_scr[...] = qkv[:, dk:2 * dk]
        v_scr[...] = qkv[:, 2 * dk:3 * dk]

    row = pl.multiple_of(qi * tq, tq)
    q = q_scr[pl.ds(row, tq), :]                              # (tq, dk) bf16

    # NT matmul: contract last dims of q and k (no explicit K transpose).
    s = lax.dot_general(q, k_scr[...], (((1,), (1,)), ((), ())),
                        preferred_element_type=jnp.float32)   # (tq, L)
    s = s - jnp.max(s, axis=-1, keepdims=True)
    e = jnp.exp(s)
    denom = jnp.sum(e, axis=-1, keepdims=True)
    if approx_recip:
        a = e * pl.reciprocal(denom, approx=True)             # EUP slot
    else:
        a = e / denom

    if attn_ref is not None:
        attn_ref[0, 0] = a.astype(attn_ref.dtype)

    ctx_ref[0, 0] = jnp.dot(a.astype(jnp.bfloat16), v_scr[...],
                            preferred_element_type=jnp.float32
                            ).astype(ctx_ref.dtype)           # (tq, dk)


# --------------------------------------------------------------------------
# Kernel 2: output projection + residual + norm1 + FFN + norm2, L-tiled.
# --------------------------------------------------------------------------
def _ffn_kernel(x_ref, ctx_ref, wo_ref, bo_ref, w1_ref, b1_ref,
                w2_ref, b2_ref, g1_ref, be1_ref, g2_ref, be2_ref,
                out_ref, *, n_heads):
    x = x_ref[0].astype(jnp.float32)                          # (tl, D)

    # Head-major output projection: sum_h ctx[h] @ Wo[h]  (static unroll).
    new_x = bo_ref[...].astype(jnp.float32)                   # (1, D) -> bcast
    for h in range(n_heads):
        new_x = new_x + jnp.dot(ctx_ref[0, h], wo_ref[h],
                                preferred_element_type=jnp.float32)

    x1 = _layer_norm(x + new_x, g1_ref[...], be1_ref[...])    # norm1 (f32)

    y = jnp.dot(x1.astype(jnp.bfloat16), w1_ref[...],
                preferred_element_type=jnp.float32) + b1_ref[...]   # conv1 (1x1)
    y = jnp.maximum(y, 0.0)                                   # ReLU in f32 (VPU)
    y = jnp.dot(y.astype(jnp.bfloat16), w2_ref[...],
                preferred_element_type=jnp.float32) + b2_ref[...]   # conv2 (1x1)

    out_ref[0] = _layer_norm(x1 + y, g2_ref[...], be2_ref[...]).astype(out_ref.dtype)


# --------------------------------------------------------------------------
# Host-side parameter repack.
# --------------------------------------------------------------------------
def prepare_params(params, n_heads, w_dtype=jnp.bfloat16):
    """Head-major weights; fused (H, D, 3*dk) QKV slab with 1/sqrt(dk) folded
    into the Q slice; matmul weights in bf16, biases/norm params in f32."""
    D = params["wq"].shape[0]
    dk = D // n_heads
    scale = 1.0 / math.sqrt(dk)

    def hm_w(w):   # (D, D) -> (H, D, dk)
        return jnp.transpose(w.reshape(D, n_heads, dk), (1, 0, 2))

    def hm_b(b):   # (1, D) -> (H, 1, dk)
        return jnp.transpose(b.reshape(1, n_heads, dk), (1, 0, 2))

    wqkv = jnp.concatenate([hm_w(params["wq"]) * scale,
                            hm_w(params["wk"]),
                            hm_w(params["wv"])], axis=-1).astype(w_dtype)
    bqkv = jnp.concatenate([hm_b(params["bq"]) * scale,
                            hm_b(params["bk"]),
                            hm_b(params["bv"])], axis=-1).astype(jnp.float32)

    f32 = jnp.float32
    return {
        "wqkv": wqkv, "bqkv": bqkv,
        "wo": params["wo"].reshape(n_heads, dk, D).astype(w_dtype),
        "bo": params["bo"].astype(f32),
        "w1": params["w1"].astype(w_dtype), "b1": params["b1"].astype(f32),
        "w2": params["w2"].astype(w_dtype), "b2": params["b2"].astype(f32),
        "g1": params["g1"].astype(f32), "be1": params["be1"].astype(f32),
        "g2": params["g2"].astype(f32), "be2": params["be2"].astype(f32),
    }


def _vmem_cap_bytes():
    """Physical VMEM (128 MiB v5e/v6e, 64 MiB v7x) minus headroom."""
    try:
        cap = int(pltpu.get_tpu_info().vmem_capacity_bytes)
    except Exception:
        cap = 64 << 20
    return max(cap - (16 << 20), 32 << 20)


# --------------------------------------------------------------------------
# Wrapper.
# --------------------------------------------------------------------------
def encoder_layer(x, params, n_heads, *, return_attention=True,
                  attn_dtype=jnp.bfloat16, q_tile=512, l_tile=512,
                  approx_softmax_recip=True):
    B, L, D = x.shape
    assert D % n_heads == 0
    dk = D // n_heads
    d_ff = params["w1"].shape[1]
    p = prepare_params(params, n_heads)

    tq = _pick_tile(L, q_tile)
    nq = L // tq
    tl = _pick_tile(L, l_tile)
    nl = L // tl

    cap = _vmem_cap_bytes()
    attn_b = jnp.dtype(attn_dtype).itemsize if return_attention else 0

    # ---------------- call 1: attention ----------------
    x16 = x.astype(jnp.bfloat16)

    in_specs_1 = [
        pl.BlockSpec((1, L, D), lambda b, h, q: (b, 0, 0)),          # x (bf16)
        pl.BlockSpec((1, D, 3 * dk), lambda b, h, q: (h, 0, 0)),     # wqkv
        pl.BlockSpec((1, 1, 3 * dk), lambda b, h, q: (h, 0, 0)),     # bqkv
    ]
    ctx_shape = jax.ShapeDtypeStruct((B, n_heads, L, dk), jnp.bfloat16)
    ctx_spec = pl.BlockSpec((1, 1, tq, dk), lambda b, h, q: (b, h, q, 0))
    if return_attention:
        out_shape_1 = (ctx_shape,
                       jax.ShapeDtypeStruct((B, n_heads, L, L), attn_dtype))
        out_specs_1 = (ctx_spec,
                       pl.BlockSpec((1, 1, tq, L), lambda b, h, q: (b, h, q, 0)))
    else:
        out_shape_1 = ctx_shape
        out_specs_1 = ctx_spec

    est1 = 2 * L * D * 2                                  # x16 block (dbl buf)
    est1 += 2 * (D * 3 * dk * 2 + 3 * dk * 4)             # wqkv + bqkv
    est1 += 2 * tq * dk * 2                               # ctx out block
    est1 += 2 * tq * L * attn_b                           # attn out block
    est1 += 3 * L * dk * 2                                # q/k/v scratch
    est1 += (3 * tq * L + L * 3 * dk + 2 * tq * dk) * 4   # live f32 temps
    vmem1 = int(min(max(est1 + (4 << 20), 32 << 20), cap))

    cost1 = pl.CostEstimate(
        flops=int(B * (6 * L * D * D + 4 * L * L * D)),
        transcendentals=int(B * n_heads * L * L),
        bytes_accessed=int(B * L * D * 2
                           + p["wqkv"].size * 2 + p["bqkv"].size * 4
                           + B * n_heads * L * dk * 2
                           + B * n_heads * L * L * attn_b))

    res1 = pl.pallas_call(
        partial(_attention_kernel, dk=dk, tq=tq,
                store_attn=return_attention, approx_recip=approx_softmax_recip),
        out_shape=out_shape_1,
        grid_spec=pltpu.PrefetchScalarGridSpec(
            num_scalar_prefetch=0,
            grid=(B, n_heads, nq),
            in_specs=in_specs_1,
            out_specs=out_specs_1,
            scratch_shapes=[pltpu.VMEM((L, dk), jnp.bfloat16) for _ in range(3)]),
        compiler_params=pltpu.CompilerParams(
            dimension_semantics=("parallel", "parallel", "arbitrary"),
            vmem_limit_bytes=vmem1),
        cost_estimate=cost1,
    )(x16, p["wqkv"], p["bqkv"])

    if return_attention:
        ctx, attn = res1
    else:
        ctx, attn = res1, None

    # ---------------- call 2: out-proj + residual + norms + FFN ----------------
    def shared(arr):
        nd = arr.ndim
        return pl.BlockSpec(tuple(arr.shape), lambda b, l, _nd=nd: (0,) * _nd)

    in_specs_2 = [
        pl.BlockSpec((1, tl, D), lambda b, l: (b, l, 0)),                 # x (orig dtype)
        pl.BlockSpec((1, n_heads, tl, dk), lambda b, l: (b, 0, l, 0)),    # ctx
        shared(p["wo"]), shared(p["bo"]),
        shared(p["w1"]), shared(p["b1"]), shared(p["w2"]), shared(p["b2"]),
        shared(p["g1"]), shared(p["be1"]), shared(p["g2"]), shared(p["be2"]),
    ]

    est2 = 2 * tl * D * x.dtype.itemsize                  # x block
    est2 += 2 * n_heads * tl * dk * 2                     # ctx block
    est2 += 2 * tl * D * x.dtype.itemsize                 # out block
    est2 += 2 * (n_heads * dk * D * 2 + D * 4)            # wo + bo
    est2 += 2 * (D * d_ff * 2 + d_ff * 4 + d_ff * D * 2 + D * 4)  # w1,b1,w2,b2
    est2 += 2 * 4 * D * 4                                 # norm params
    est2 += (tl * d_ff + 6 * tl * D) * 4                  # intermediates
    vmem2 = int(min(max(est2 + (4 << 20), 32 << 20), cap))

    cost2 = pl.CostEstimate(
        flops=int(B * (2 * L * D * D + 4 * L * D * d_ff)),
        transcendentals=int(2 * B * L),
        bytes_accessed=int(2 * B * L * D * x.dtype.itemsize
                           + B * n_heads * L * dk * 2
                           + sum(int(p[k].size) * p[k].dtype.itemsize
                                 for k in ("wo", "bo", "w1", "b1", "w2", "b2",
                                           "g1", "be1", "g2", "be2"))))

    out = pl.pallas_call(
        partial(_ffn_kernel, n_heads=n_heads),
        out_shape=jax.ShapeDtypeStruct((B, L, D), x.dtype),
        grid_spec=pltpu.PrefetchScalarGridSpec(
            num_scalar_prefetch=0,
            grid=(B, nl),
            in_specs=in_specs_2,
            out_specs=pl.BlockSpec((1, tl, D), lambda b, l: (b, l, 0))),
        compiler_params=pltpu.CompilerParams(
            dimension_semantics=("parallel", "parallel"),
            vmem_limit_bytes=vmem2),
        cost_estimate=cost2,
    )(x, ctx, p["wo"], p["bo"], p["w1"], p["b1"], p["w2"], p["b2"],
      p["g1"], p["be1"], p["g2"], p["be2"])

    return (out, attn) if return_attention else out


# --------------------------------------------------------------------------
# Parameter init + pure-JAX reference (mirrors the PyTorch forward, eval mode).
# --------------------------------------------------------------------------
def init_params(key, d_model, d_ff, dtype=jnp.float32):
    ks = jax.random.split(key, 16)

    def lin(k, fan_in, fan_out):
        return jax.random.normal(k, (fan_in, fan_out), dtype) / math.sqrt(fan_in)

    def bias(k, n):
        return 0.02 * jax.random.normal(k, (1, n), dtype)

    return {
        "wq": lin(ks[0], d_model, d_model), "bq": bias(ks[1], d_model),
        "wk": lin(ks[2], d_model, d_model), "bk": bias(ks[3], d_model),
        "wv": lin(ks[4], d_model, d_model), "bv": bias(ks[5], d_model),
        "wo": lin(ks[6], d_model, d_model), "bo": bias(ks[7], d_model),
        "w1": lin(ks[8], d_model, d_ff),   "b1": bias(ks[9], d_ff),
        "w2": lin(ks[10], d_ff, d_model),  "b2": bias(ks[11], d_model),
        "g1": jnp.ones((1, d_model), dtype),  "be1": jnp.zeros((1, d_model), dtype),
        "g2": jnp.ones((1, d_model), dtype),  "be2": jnp.zeros((1, d_model), dtype),
    }


def ref_forward(x, p, n_heads):
    B, L, D = x.shape
    dk = D // n_heads

    def ln(v, g, b, eps=1e-5):
        m = jnp.mean(v, axis=-1, keepdims=True)
        var = jnp.mean((v - m) ** 2, axis=-1, keepdims=True)
        return (v - m) * lax.rsqrt(var + eps) * g + b

    q = (x @ p["wq"] + p["bq"]).reshape(B, L, n_heads, dk)
    k = (x @ p["wk"] + p["bk"]).reshape(B, L, n_heads, dk)
    v = (x @ p["wv"] + p["bv"]).reshape(B, L, n_heads, dk)
    s = jnp.einsum("blhe,bshe->bhls", q, k,
                   precision=lax.Precision.HIGHEST) / math.sqrt(dk)
    a = jax.nn.softmax(s, axis=-1)
    o = jnp.einsum("bhls,bshd->blhd", a, v,
                   precision=lax.Precision.HIGHEST).reshape(B, L, D)
    new_x = o @ p["wo"] + p["bo"]
    x1 = ln(x + new_x, p["g1"], p["be1"])
    y = jnp.maximum(x1 @ p["w1"] + p["b1"], 0.0)
    y = y @ p["w2"] + p["b2"]
    return ln(x1 + y, p["g2"], p["be2"]), a


if __name__ == "__main__":
    # --- small sanity shape (single q-tile path) ---
    B, L, d_model, n_heads = 2, 8, 32, 2
    d_ff = 4 * d_model

    key = jax.random.PRNGKey(0)
    kx, kp = jax.random.split(key)
    x = jax.random.normal(kx, (B, L, d_model), jnp.float32)
    params = init_params(kp, d_model, d_ff)

    out, attn = encoder_layer(x, params, n_heads, return_attention=True)
    out = jax.block_until_ready(out)
    attn = jax.block_until_ready(attn)

    out_ref, attn_ref = ref_forward(x, params, n_heads)
    assert out.shape == (B, L, d_model) and attn.shape == (B, n_heads, L, L)
    assert jnp.allclose(out, out_ref, atol=5e-2, rtol=5e-2)
    assert jnp.allclose(attn.astype(jnp.float32), attn_ref, atol=5e-2, rtol=5e-2)

    # Without attention maps (skips the (B, H, L, L) HBM writeback entirely).
    out2 = jax.block_until_ready(
        encoder_layer(x, params, n_heads, return_attention=False))
    assert jnp.allclose(out2, out_ref, atol=5e-2, rtol=5e-2)

    # --- slightly larger shape to exercise the multi-tile (nq > 1, nl > 1) path ---
    B2, L2, D2, H2 = 1, 128, 128, 4
    x2 = jax.random.normal(jax.random.PRNGKey(1), (B2, L2, D2), jnp.float32)
    p2 = init_params(jax.random.PRNGKey(2), D2, 4 * D2)
    o2, a2 = encoder_layer(x2, p2, H2, return_attention=True,
                           q_tile=64, l_tile=64)
    o2 = jax.block_until_ready(o2)
    a2 = jax.block_until_ready(a2)
    o2_ref, a2_ref = ref_forward(x2, p2, H2)
    assert jnp.allclose(o2, o2_ref, atol=5e-2, rtol=5e-2)
    assert jnp.allclose(a2.astype(jnp.float32), a2_ref, atol=5e-2, rtol=5e-2)

    print("KERNEL_OK")
</pallas_src>

<mosaic_0001>
module attributes {stable_mosaic.version = 11 : i64} {
  func.func @_attention_kernel(%arg0: i32, %arg1: i32, %arg2: i32, %arg3: memref<1x8x32xbf16, #tpu.memory_space<vmem>>, %arg4: memref<1x32x48xbf16, #tpu.memory_space<vmem>>, %arg5: memref<1x1x48xf32, #tpu.memory_space<vmem>>, %arg6: memref<1x1x8x16xbf16, #tpu.memory_space<vmem>>, %arg7: memref<1x1x8x8xbf16, #tpu.memory_space<vmem>>, %arg8: memref<8x16xbf16, #tpu.memory_space<vmem>>, %arg9: memref<8x16xbf16, #tpu.memory_space<vmem>>, %arg10: memref<8x16xbf16, #tpu.memory_space<vmem>>) attributes {dimension_semantics = [#tpu.dimension_semantics<parallel>, #tpu.dimension_semantics<parallel>, #tpu.dimension_semantics<arbitrary>], iteration_bounds = array<i64: 2, 2, 1>, scalar_prefetch = 0 : i64, scratch_operands = 3 : i64, tpu.core_type = #tpu.core_type<tc>, window_params = [{transform_indices = @transform_0, window_bounds = array<i64: 1, 8, 32>}, {transform_indices = @transform_1, window_bounds = array<i64: 1, 32, 48>}, {transform_indices = @transform_2, window_bounds = array<i64: 1, 1, 48>}, {transform_indices = @transform_3, window_bounds = array<i64: 1, 1, 8, 16>}, {transform_indices = @transform_4, window_bounds = array<i64: 1, 1, 8, 8>}]} {
    %c0_i32 = arith.constant 0 : i32
    %0 = arith.cmpi eq, %arg2, %c0_i32 : i32
    %1 = arith.extui %0 : i1 to i32
    %c0_i32_0 = arith.constant 0 : i32
    %2 = arith.cmpi ne, %1, %c0_i32_0 : i32
    scf.if %2 {
      %c0_16 = arith.constant 0 : index
      %c0_17 = arith.constant 0 : index
      %c0_18 = arith.constant 0 : index
      %30 = vector.load %arg3[%c0_16, %c0_17, %c0_18] : memref<1x8x32xbf16, #tpu.memory_space<vmem>>, vector<1x8x32xbf16>
      %31 = vector.shape_cast %30 : vector<1x8x32xbf16> to vector<8x32xbf16>
      %c0_19 = arith.constant 0 : index
      %c0_20 = arith.constant 0 : index
      %c0_21 = arith.constant 0 : index
      %32 = vector.load %arg4[%c0_19, %c0_20, %c0_21] : memref<1x32x48xbf16, #tpu.memory_space<vmem>>, vector<1x32x48xbf16>
      %33 = vector.shape_cast %32 : vector<1x32x48xbf16> to vector<32x48xbf16>
      %cst_22 = arith.constant dense<0.000000e+00> : vector<8x48xf32>
      %34 = tpu.matmul %31, %33, %cst_22 {dimension_numbers = #tpu.dot_dimension_numbers<[1], [0], [0], [1], [0, 0, 1, 1], [], []>} : vector<8x32xbf16>, vector<32x48xbf16>, vector<8x48xf32> -> vector<8x48xf32>
      %c0_23 = arith.constant 0 : index
      %c0_24 = arith.constant 0 : index
      %c0_25 = arith.constant 0 : index
      %35 = vector.load %arg5[%c0_23, %c0_24, %c0_25] : memref<1x1x48xf32, #tpu.memory_space<vmem>>, vector<1x1x48xf32>
      %36 = vector.shape_cast %35 : vector<1x1x48xf32> to vector<1x48xf32>
      %37 = vector.broadcast %36 : vector<1x48xf32> to vector<8x48xf32>
      %38 = arith.addf %34, %37 : vector<8x48xf32>
      %39 = arith.truncf %38 : vector<8x48xf32> to vector<8x48xbf16>
      %40 = vector.extract_strided_slice %39 {offsets = [0, 0], sizes = [8, 16], strides = [1, 1]} : vector<8x48xbf16> to vector<8x16xbf16>
      %c0_26 = arith.constant 0 : index
      %c0_27 = arith.constant 0 : index
      %41 = vector.load %arg8[%c0_26, %c0_27] : memref<8x16xbf16, #tpu.memory_space<vmem>>, vector<8x16xbf16>
      tpu.vector_store %arg8[%c0_26, %c0_27], %40 {strides = array<i32>} : memref<8x16xbf16, #tpu.memory_space<vmem>>, vector<8x16xbf16>,
      %42 = vector.extract_strided_slice %39 {offsets = [0, 16], sizes = [8, 16], strides = [1, 1]} : vector<8x48xbf16> to vector<8x16xbf16>
      %c0_28 = arith.constant 0 : index
      %c0_29 = arith.constant 0 : index
      %43 = vector.load %arg9[%c0_28, %c0_29] : memref<8x16xbf16, #tpu.memory_space<vmem>>, vector<8x16xbf16>
      tpu.vector_store %arg9[%c0_28, %c0_29], %42 {strides = array<i32>} : memref<8x16xbf16, #tpu.memory_space<vmem>>, vector<8x16xbf16>,
      %44 = vector.extract_strided_slice %39 {offsets = [0, 32], sizes = [8, 16], strides = [1, 1]} : vector<8x48xbf16> to vector<8x16xbf16>
      %c0_30 = arith.constant 0 : index
      %c0_31 = arith.constant 0 : index
      %45 = vector.load %arg10[%c0_30, %c0_31] : memref<8x16xbf16, #tpu.memory_space<vmem>>, vector<8x16xbf16>
      tpu.vector_store %arg10[%c0_30, %c0_31], %44 {strides = array<i32>} : memref<8x16xbf16, #tpu.memory_space<vmem>>, vector<8x16xbf16>,
    } else {
    }
    %c8_i32 = arith.constant 8 : i32
    %3 = arith.muli %arg2, %c8_i32 : i32
    %4 = tpu.assume_multiple %3, 8 : i32
    %5 = arith.index_cast %4 : i32 to index
    %c0 = arith.constant 0 : index
    %6 = vector.load %arg8[%5, %c0] : memref<8x16xbf16, #tpu.memory_space<vmem>>, vector<8x16xbf16>
    %c0_1 = arith.constant 0 : index
    %c0_2 = arith.constant 0 : index
    %7 = vector.load %arg9[%c0_1, %c0_2] : memref<8x16xbf16, #tpu.memory_space<vmem>>, vector<8x16xbf16>
    %cst = arith.constant dense<0.000000e+00> : vector<8x8xf32>
    %8 = tpu.matmul %6, %7, %cst {dimension_numbers = #tpu.dot_dimension_numbers<[1], [1], [0], [0], [0, 0, 1, 0], [], []>} : vector<8x16xbf16>, vector<8x16xbf16>, vector<8x8xf32> -> vector<8x8xf32>
    %cst_3 = arith.constant dense<0xFF800000> : vector<8xf32>
    %9 = vector.multi_reduction <maximumf>, %8, %cst_3 [1] : vector<8x8xf32> to vector<8xf32>
    %10 = vector.shape_cast %9 : vector<8xf32> to vector<8x1xf32>
    %11 = vector.broadcast %10 : vector<8x1xf32> to vector<8x8xf32>
    %12 = arith.subf %8, %11 : vector<8x8xf32>
    %13 = math.exp %12 : vector<8x8xf32>
    %cst_4 = arith.constant dense<0.000000e+00> : vector<8xf32>
    %14 = vector.multi_reduction <add>, %13, %cst_4 [1] : vector<8x8xf32> to vector<8xf32>
    %15 = vector.shape_cast %14 : vector<8xf32> to vector<8x1xf32>
    %16 = tpu.reciprocal %15 {approx = true} : vector<8x1xf32> -> vector<8x1xf32>
    %17 = vector.broadcast %16 : vector<8x1xf32> to vector<8x8xf32>
    %18 = arith.mulf %13, %17 : vector<8x8xf32>
    %19 = arith.truncf %18 : vector<8x8xf32> to vector<8x8xbf16>
    %c0_5 = arith.constant 0 : index
    %c0_6 = arith.constant 0 : index
    %c0_7 = arith.constant 0 : index
    %c0_8 = arith.constant 0 : index
    %20 = vector.load %arg7[%c0_5, %c0_6, %c0_7, %c0_8] : memref<1x1x8x8xbf16, #tpu.memory_space<vmem>>, vector<1x1x8x8xbf16>
    %21 = vector.shape_cast %20 : vector<1x1x8x8xbf16> to vector<8x8xbf16>
    %22 = vector.shape_cast %19 : vector<8x8xbf16> to vector<1x1x8x8xbf16>
    tpu.vector_store %arg7[%c0_5, %c0_6, %c0_7, %c0_8], %22 {strides = array<i32>} : memref<1x1x8x8xbf16, #tpu.memory_space<vmem>>, vector<1x1x8x8xbf16>,
    %23 = arith.truncf %18 : vector<8x8xf32> to vector<8x8xbf16>
    %c0_9 = arith.constant 0 : index
    %c0_10 = arith.constant 0 : index
    %24 = vector.load %arg10[%c0_9, %c0_10] : memref<8x16xbf16, #tpu.memory_space<vmem>>, vector<8x16xbf16>
    %cst_11 = arith.constant dense<0.000000e+00> : vector<8x16xf32>
    %25 = tpu.matmul %23, %24, %cst_11 {dimension_numbers = #tpu.dot_dimension_numbers<[1], [0], [0], [1], [0, 0, 1, 1], [], []>} : vector<8x8xbf16>, vector<8x16xbf16>, vector<8x16xf32> -> vector<8x16xf32>
    %26 = arith.truncf %25 : vector<8x16xf32> to vector<8x16xbf16>
    %c0_12 = arith.constant 0 : index
    %c0_13 = arith.constant 0 : index
    %c0_14 = arith.constant 0 : index
    %c0_15 = arith.constant 0 : index
    %27 = vector.load %arg6[%c0_12, %c0_13, %c0_14, %c0_15] : memref<1x1x8x16xbf16, #tpu.memory_space<vmem>>, vector<1x1x8x16xbf16>
    %28 = vector.shape_cast %27 : vector<1x1x8x16xbf16> to vector<8x16xbf16>
    %29 = vector.shape_cast %26 : vector<8x16xbf16> to vector<1x1x8x16xbf16>
    tpu.vector_store %arg6[%c0_12, %c0_13, %c0_14, %c0_15], %29 {strides = array<i32>} : memref<1x1x8x16xbf16, #tpu.memory_space<vmem>>, vector<1x1x8x16xbf16>,
    return
  }
  func.func @transform_0(%arg0: i32, %arg1: i32, %arg2: i32) -> (i32, i32, i32) {
    %c0_i32 = arith.constant 0 : i32
    %c0_i32_0 = arith.constant 0 : i32
    %c0_i32_1 = arith.constant 0 : i32
    return %arg0, %c0_i32, %c0_i32_0 : i32, i32, i32
  }
  func.func @transform_1(%arg0: i32, %arg1: i32, %arg2: i32) -> (i32, i32, i32) {
    %c0_i32 = arith.constant 0 : i32
    %c0_i32_0 = arith.constant 0 : i32
    %c0_i32_1 = arith.constant 0 : i32
    return %arg1, %c0_i32, %c0_i32_0 : i32, i32, i32
  }
  func.func @transform_2(%arg0: i32, %arg1: i32, %arg2: i32) -> (i32, i32, i32) {
    %c0_i32 = arith.constant 0 : i32
    %c0_i32_0 = arith.constant 0 : i32
    %c0_i32_1 = arith.constant 0 : i32
    return %arg1, %c0_i32, %c0_i32_0 : i32, i32, i32
  }
  func.func @transform_3(%arg0: i32, %arg1: i32, %arg2: i32) -> (i32, i32, i32, i32) {
    %c0_i32 = arith.constant 0 : i32
    %c0_i32_0 = arith.constant 0 : i32
    return %arg0, %arg1, %arg2, %c0_i32 : i32, i32, i32, i32
  }
  func.func @transform_4(%arg0: i32, %arg1: i32, %arg2: i32) -> (i32, i32, i32, i32) {
    %c0_i32 = arith.constant 0 : i32
    %c0_i32_0 = arith.constant 0 : i32
    return %arg0, %arg1, %arg2, %c0_i32 : i32, i32, i32, i32
  }
}

</mosaic_0001>

<bundles_post_ra>
// kernel: tpu_custom_call.1
= control target key start
LH: loop header
LB: loop body
LE: loop exit
PB: predicated region body
PF: predicated region fallthrough
CT: control target
= control target key end

     0   :  { %s1558_s0 = inlined_call_operand.hbm [shape: bf16[2,8,32], index: 0, kind: input, shape index: {}]   ;;  %s1559_s1 = inlined_call_operand.hbm [shape: bf16[2,32,48], index: 1, kind: input, shape index: {}]   ;;  %s1560_s2 = inlined_call_operand.vmem [shape: f32[2,1,48], index: 2, kind: input, shape index: {}]   ;;  %s1561_s3 = inlined_call_operand.hbm [shape: bf16[2,2,8,16], index: 3, kind: output, shape index: {0}]   ;;  %s1562_s4 = inlined_call_operand.hbm [shape: bf16[2,2,8,8], index: 4, kind: output, shape index: {1}]  }
   0x1   :  { %1577 = sst [smem:[#allocation24_spill]] %s1558_s0 }
   0x2   :  { %1578 = sst [smem:[#allocation25_spill]] %s1561_s3 }
   0x3   :  { %1579 = sst [smem:[#allocation26_spill]] %s1562_s4 }
   0x4   :  { %10 = vsyncpa [#allocation6], 0 }
   0x5   :  { %12 = vsyncpa [#allocation6 + $0x1], 0 }
   0x6   :  { %13 = vsyncpa [#allocation9], 0 }
   0x7   :  { %15 = vsyncpa [#allocation9 + $0x1], 0 }
   0x8   :  { %16 = vsyncpa [#allocation7], 0 }
   0x9   :  { %18 = vsyncpa [#allocation7 + $0x1], 0 }
   0xa   :  { %19 = vsyncpa [#allocation12], 0 }
   0xb   :  { %21 = vsyncpa [#allocation12 + $0x1], 0  ;;  %s1191_s15 = smov 0   ;;  %s1193_s16 = smov 0  }
   0xc   :  { %s1195_s17 = smov 0   ;;  %s1197_s18 = smov 0  }
   0xd   :  { %s1199_s19 = smov 0   ;;  %s1201_s20 = smov 0  }
   0xe   :  { %s1203_s21 = smov 0   ;;  %s1205_s22 = smov 0  }
   0xf   :  { %s1207_s23 = smov 0   ;;  %s1209_s24 = smov 0  }
  0x10   :  { %s1211_s25 = smov 0   ;;  %s1213_s26 = smov 0  }
  0x11   :  { %s1215_s27 = smov 0   ;;  %s1217_s28 = smov 0  }
  0x12 LB: > { %1580 = sst [smem:[#allocation17_spill]] %s1102_s15  ;;  %s706_s29 = sadd.s32 4294967295, %s1154_s28   ;;  %s1154_s28 = sphi %s1217_s28, %s27_s28   ;;  %s1150_s27 = sphi %s1215_s27, %s1616_s27   ;;  %s1146_s26 = sphi %s1213_s26, %s1628_s26   ;;  %s1142_s25 = sphi %s1211_s25, %s1627_s25   ;;  %s1138_s24 = sphi %s1209_s24, %s1626_s24   ;;  %s1134_s23 = sphi %s1207_s23, %s1625_s23   ;;  %s1130_s22 = sphi %s1205_s22, %s1624_s22   ;;  %s1126_s21 = sphi %s1203_s21, %s1623_s21   ;;  %s1122_s20 = sphi %s1201_s20, %s1622_s20   ;;  %s1118_s19 = sphi %s1199_s19, %s1621_s19   ;;  %s1114_s18 = sphi %s1197_s18, %s1620_s18   ;;  %s1110_s17 = sphi %s1195_s17, %s1619_s17   ;;  %s1106_s16 = sphi %s1193_s16, %s1618_s16   ;;  %s1102_s15 = sphi %s1191_s15, %s1617_s15  }
  0x13   : > { %1581 = sst [smem:[#allocation18_spill]] %s1150_s27  ;;  %p60_p0 = scmp.ne.s32.totalorder %s1134_s23, %s1130_s22 }
  0x14   : > { %1582 = sst [smem:[#allocation19_spill]] %s1154_s28  ;;  %p61_p1 = scmp.eq.s32.totalorder %s1154_s28, 0 }
  0x15   : > { %p66_p2 = scmp.ne.s32.totalorder %s1130_s22, %s1126_s21  ;;  %p67_p3 = scmp.eq.s32.totalorder %s706_s29, 0 }
  0x16   : > { %p86_p4 = scmp.ne.s32.totalorder %s1122_s20, %s1118_s19  ;;  %p1266_p5 = por %p61_p1, %p60_p0 }
  0x17   : > { %p92_p6 = scmp.ne.s32.totalorder %s1118_s19, %s1114_s18  ;;  %p1271_p7 = por %p67_p3, %p66_p2 }
  0x18   : > { %p88_p8 = por %p86_p4, %p61_p1  ;;  %p1279_p10 = scmp.eq.s32.totalorder %s706_s29, 3 }
  0x19   : > { %s1584_s7 = scalar_select %p1271_p7, 1, 0 }
  0x1a   : > { %p1275_p9 = por %p92_p6, %p67_p3  ;;  %p786_p11 = scmp.lt.s32.totalorder %s1154_s28, 4 }
  0x1b   : > { %s202_s10 = sand.u32 1, %s1134_s23   ;;  %s711_s11 = sshll.u32 %s1150_s27, 6 }
  0x1c   : > { %s1585_s8 = scalar_select %p1275_p9, 1, 0 }
  0x1d   : > { %s710_s12 = sshll.u32 %s202_s10, 2  ;;  %s1587_s0 = sld [smem:[#allocation24_spill]] }
  0x1e   : > { %s206_s21 = scalar_lea.vmem [#allocation5], %s710_s12  ;;  %p1293_p12 = pnand %p786_p11, %p1266_p5 }
  0x1f   : > { %s213_s5 = sshll.u32 %s206_s21, 4  ;;  %p1299_p13 = pnand %p786_p11, %p88_p8  ;;  %s1297_s5 = int_to_ptr.vmem [resolvable:$true] %s213_s5 }
  0x20   : > { %p914_p2 = pneg %p1293_p12 }
  0x21   : > { %s1589_s30 = scalar_select %p1299_p13, 1, 0 }
  0x23   : > { %s1289_s18 = scalar_lea.hbm %s1587_s0, %s711_s11  ;;  %s203_s11 = scalar_lea.sflag [#allocation6], %s202_s10 }
  0x24   : > { %s912_s13 = scalar_lea.hbm %s1289_s18, 64  ;;  %s917_s14 = scalar_lea.hbm %s1587_s0, 128 }
  0x25   : > { %p913_p1 = scmp.ne.s32.totalorder %s1289_s18, %s912_s13  ;;  %p918_p5 = scmp.lt.u32.totalorder %s1289_s18, %s1587_s0 }
  0x26   : > { %p919_p6 = scmp.lt.u32.totalorder %s917_s14, %s912_s13  ;;  %p921_p11 = scmp.lt.u32.totalorder %s912_s13, %s1289_s18 }
  0x27   : > { %p915_p3 = pnand %p914_p2, %p913_p1 }
  0x28   : > { %p920_p8 = por %p919_p6, %p918_p5 }
  0x29   : > { %p916_p4 = pneg %p915_p3 }
  0x2a   : > { %p922_p0 = por %p921_p11, %p920_p8 }
  0x2c   : > { %p923_p9 = pnand %p922_p0, %p916_p4 }
  0x2e   : > { %926 = shalt.err (!%p923_p9)
}
  0x2f   : > { %s927_s10 = scalar_lea.vmem %s1297_s5, 64  ;;  %s1156_s6 = smov [#allocation5]  }
  0x30   : > { %p928_p1 = scmp.ne.s32.totalorder %s1297_s5, %s927_s10  ;;  %s932_s12 = sshll.u32 %s1156_s6, 4  ;;  %s933_s12 = int_to_ptr.vmem [resolvable:$false] %s932_s12 }
  0x31   : > { %s934_s3 = scalar_lea.vmem %s933_s12, 128  ;;  %p935_p13 = scmp.lt.s32.totalorder %s1297_s5, %s933_s12 }
  0x32   : > { %p930_p3 = pnand %p928_p1, %p914_p2  ;;  %p936_p5 = scmp.lt.s32.totalorder %s934_s3, %s927_s10 }
  0x34   : > { %p931_p7 = pneg %p930_p3  ;;  %p937_p6 = por %p936_p5, %p935_p13 }
  0x36   : > { %p938_p8 = pnand %p937_p6, %p931_p7 }
  0x38   : > { %941 = shalt.err (!%p938_p8)
}
  0x39   : > { %775 = dma.hbm_to_vmem [thread:$0]  (!%p1293_p12), %s1289_s18, 64, %s1297_s5, %s203_s11  }
  0x3a   : > { %p245_p7 = scmp.lt.s32.totalorder %s1154_s28, 5  ;;  %p1590_p9 = scmp.ge.s32.totalorder %s1154_s28, 1 }
  0x3b   : > { %s707_s13 = sadd.s32 4294967294, %s1154_s28   ;;  %s42_s14 = sadd.s32 1, %s1146_s26 }
  0x3c   : > { %p1332_p13 = pnand %p1590_p9, %p245_p7  ;;  %s79_s21 = sadd.s32 1, %s1122_s20 }
  0x3d   : > { %p44_p0 = scmp.ge.s32.totalorder %s42_s14, 2  ;;  %s135_s10 = sadd.s32 1, %s1110_s17 }
  0x3e   : > { %p145_p2 = scmp.ne.s32.totalorder %s1110_s17, %s1106_s16  ;;  %p151_p4 = scmp.ne.s32.totalorder %s1106_s16, %s1102_s15 }
  0x3f   : > { %s1630_s14 = smov (%p44_p0, %s42_s14), 0  ;;  %s1593_s5 = sadd.s32 1, %s1150_s27 }
  0x40   : > { %1592 = sst [smem:[#allocation20_spill]] %s1630_s14  ;;  %s1632_s5 = smov (!%p44_p0, %s1593_s5), %s1150_s27 }
  0x41   : > { %s76_s18 = ssub.s32 %s1146_s26, %s1630_s14  ;;  %p1353_p12 = por %p1279_p10, %p145_p2 }
  0x42   : > { %p48_p11 = scmp.ge.s32.totalorder %s1632_s5, 2  ;;  %p77_p1 = scmp.eq.s32.totalorder %s76_s18, 0 }
  0x43   : > { %s1594_s11 = scalar_select %p1353_p12, 1, 0 }
  0x44   : > { %p152_p3 = scmp.eq.s32.totalorder %s707_s13, 3  ;;  %s220_s6 = sand.u32 1, %s1122_s20  }
  0x45   : > { %1595 = sst [smem:[#allocation21_spill]] %s1594_s11  ;;  %s1634_s5 = smov (%p48_p11, %s1632_s5), 0 }
  0x46   : > { %1596 = sst [smem:[#allocation22_spill]] %s1634_s5  ;;  %s50_s3 = ssub.s32 %s1150_s27, %s1634_s5 }
  0x47   : > { %s1361_s12 = scalar_select %p77_p1, %s1122_s20, %s79_s21  }
  0x48   : > { %p1365_p5 = por %p152_p3, %p151_p4  ;;  %p51_p10 = scmp.eq.s32.totalorder %s50_s3, 0 }
  0x49   : > { %1597 = sst [smem:[#allocation23_spill]] %s1361_s12  ;;  %s130_s9 = sor.u32 %s76_s18, %s50_s3 }
  0x4a   : > { %s1598_s0 = scalar_select %p1365_p5, 1, 0 }
  0x4b   : > { %p133_p6 = scmp.eq.s32.totalorder %s130_s9, 0  ;;  %s1599_s14 = sadd.s32 1, %s1134_s23 }
  0x4c   : > { %s1372_s15 = scalar_select %p51_p10, %s1134_s23, %s1599_s14  }
  0x4d   : > { %s1375_s13 = scalar_select %p133_p6, %s1110_s17, %s135_s10  }
  0x4e   : > { %s712_s28 = sshll.u32 %s220_s6, 4  ;;  %s735_s4 = sshll.u32 %s1146_s26, 8 }
  0x4f   : > { %s1381_s5 = scalar_lea.hbm %s1559_s1, %s735_s4  ;;  %s224_s27 = scalar_lea.vmem [#allocation8], %s712_s28 }
  0x50   : > { %s231_s12 = sshll.u32 %s224_s27, 4  ;;  %s1385_s18 = scalar_lea.sflag [#allocation9], %s220_s6  ;;  %s1383_s12 = int_to_ptr.vmem [resolvable:$true] %s231_s12 }
  0x51   : > { %s942_s14 = scalar_lea.hbm %s1381_s5, 256  ;;  %p1600_p7 = scmp.ne.s32.totalorder %s1589_s30, 0 }
  0x52   : > { %p943_p8 = scmp.ne.s32.totalorder %s1381_s5, %s942_s14  ;;  %s947_s11 = scalar_lea.hbm %s1559_s1, 512 }
  0x53   : > { %p944_p9 = pneg %p1600_p7  ;;  %p948_p4 = scmp.lt.u32.totalorder %s1381_s5, %s1559_s1 }
  0x54   : > { %p949_p11 = scmp.lt.u32.totalorder %s947_s11, %s942_s14  ;;  %p951_p3 = scmp.lt.u32.totalorder %s942_s14, %s1381_s5 }
  0x55   : > { %p945_p0 = pnand %p944_p9, %p943_p8 }
  0x56   : > { %p950_p1 = por %p949_p11, %p948_p4 }
  0x57   : > { %p946_p2 = pneg %p945_p0 }
  0x58   : > { %p952_p10 = por %p951_p3, %p950_p1 }
  0x5a   : > { %p953_p6 = pnand %p952_p10, %p946_p2 }
  0x5c   : > { %956 = shalt.err (!%p953_p6)
}
  0x5d   : > { %s957_s27 = scalar_lea.vmem %s1383_s12, 256  ;;  %s1157_s28 = smov [#allocation8]  }
  0x5e   : > { %p958_p8 = scmp.ne.s32.totalorder %s1383_s12, %s957_s27  ;;  %s962_s6 = sshll.u32 %s1157_s28, 4  ;;  %s963_s6 = int_to_ptr.vmem [resolvable:$false] %s962_s6 }
  0x5f   : > { %s964_s21 = scalar_lea.vmem %s963_s6, 512  ;;  %p965_p12 = scmp.lt.s32.totalorder %s1383_s12, %s963_s6 }
  0x60   : > { %p960_p0 = pnand %p958_p8, %p944_p9  ;;  %p966_p4 = scmp.lt.s32.totalorder %s964_s21, %s957_s27 }
  0x62   : > { %p961_p5 = pneg %p960_p0  ;;  %p967_p11 = por %p966_p4, %p965_p12 }
  0x64   : > { %p968_p1 = pnand %p967_p11, %p961_p5 }
  0x66   : > { %971 = shalt.err (!%p968_p1)
}
  0x67   : > { %s1158_s14 = smov 64   ;;  %s1159_s4 = smov 4  }
  0x68   : > { %778 = dma.hbm_to_vmem [thread:$0]  (!%p1600_p7), %s1381_s5, 256, %s1383_s12, %s1385_s18, %s1158_s14, %s1158_s14, %s1159_s4  }
  0x69   : > { %249 = sbr.rel (%p1332_p13) target bundleno = 1231 (0x4cf), region = 32  ;;  %s251_s10 = sand.u32 (!%p1332_p13), 1, %s1130_s22  }
  0x6a   : > { %s716_s11 = sshll.u32 (!%p1332_p13), %s251_s10, 2  ;;  %s252_s3 = scalar_lea.sflag (!%p1332_p13), [#allocation6], %s251_s10 }
  0x6b   : > { %s255_s9 = scalar_lea.vmem (!%p1332_p13), [#allocation5], %s716_s11  ;;  %p1601_p12 = scmp.ne.s32.totalorder (!%p1332_p13), %s1584_s7, 0 }
  0x70   : > { %1085 = dma.done.wait (%p1601_p12), %s252_s3, 64  }
  0x71   : > { %1087 = vsyncadd (%p1601_p12), %s252_s3, 4294967232  ;;  %s260_s27 = sand.u32 1, %s1118_s19   ;;  %p1602_p5 = scmp.ne.s32.totalorder %s1585_s8, 0 }
  0x72   : > { %s717_s28 = sshll.u32 %s260_s27, 4  ;;  %s261_s30 = scalar_lea.sflag [#allocation9], %s260_s27 }
  0x73   : > { %s264_s5 = scalar_lea.vmem [#allocation8], %s717_s28 }
  0x74   : > { %1089 = dma.done.wait (%p1602_p5), %s261_s30, 256  }
  0x75   : > { %1091 = vsyncadd (%p1602_p5), %s261_s30, 4294967040  ;;  %v1160_v0 = vmov 0.0   ;;  %vm1161_vm0 = vmmov 0   ;;  %v906_v1 = vld [vmem:[%s264_s5] sm:$0xff]   ;;  %v907_v2 = vld [vmem:[%s264_s5 + $0x8] sm:$0xff]   ;;  %vm334_vm1 = vcmask 261120  }
  0x76   : > { %744 = vmatprep.subr.bf16.mxu0 %v1160_v0  ;;  %748 = vmatprep.mubr.msk.bf16.mxu0 %vm1161_vm0, %v1160_v0  ;;  %v310_v3 = vld [vmem:[%s255_s9] sm:$0xf]  ;;  %p302_p13 = scmp.lt.s32.totalorder %s1138_s24, 1  ;;  %vm379_vm2 = vcmask 125952   ;;  %s1162_s18 = smov 112   ;;  %vm399_vm3 = vcmask 130048  }
  0x77   : > { %752 = vmatprep.subr.bf16.mxu1 %v1160_v0  ;;  %754 = vmatprep.mubr.msk.bf16.mxu1 %vm1161_vm0, %v1160_v0  ;;  %vm446_vm4 = vcmask 64512   ;;  %s1163_s6 = smov 96   ;;  %s1436_s21 = sand.u32 1, %s1106_s16   ;;  %vm465_vm5 = vcmask 1043456   ;;  %vm459_vm6 = vcmask 60416  }
  0x78   : > { %745 = vmatpush3.bf16.msra.mxu0 %v906_v1  ;;  %s303_s7 = scalar_select %p302_p13, %s1138_s24, 1 }
  0x79   : > { %746 = vmatprep.subr.bf16.mxu0 %v1160_v0  ;;  %s718_s14 = sshll.u32 %s1436_s21, 2  ;;  %s1603_s4 = sld [smem:[#allocation21_spill]] }
  0x7a   : > { %s304_s12 = scalar_lea.vmem %s1560_s2, %s303_s7  ;;  %s301_s10 = scalar_lea.vmem [#allocation11], %s718_s14 }
  0x7b   : > { %v720_v4 = vld [vmem:[%s304_s12] ss:$0 sm:$0xff]  ;;  %s729_s11 = sshll.u32 %s1142_s25, 1  ;;  %s1604_s30 = sld [smem:[#allocation26_spill]] }
  0x7c   : > { %747 = vmatpush3.bf16.msra.mxu0 %v907_v2  ;;  %s1444_s3 = sadd.s32 %s1138_s24, %s729_s11  ;;  %s550_s7 = sshll.u32 %s301_s10, 4  ;;  %s551_s7 = int_to_ptr.vmem [resolvable:$true] %s550_s7 }
  0x7d   : > { %758 = vmatprep.subr.bf16.mxu0 %v1160_v0  ;;  %s730_s9 = sshll.u32 %s1444_s3, 6  ;;  %s518_s8 = scalar_lea.sflag [#allocation12], %s1436_s21 }
  0x7e   : > { %s972_s29 = scalar_lea.vmem %s551_s7, 64  ;;  %s1164_s25 = smov [#allocation11]  }
  0x7f   : > { %749 = vmatmul.mubr.msk.bf16.vlgmr.msra.gmra.mrb[0].mxu0 %vm334_vm1, %v310_v3  ;;  %p973_p7 = scmp.ne.s32.totalorder %s551_s7, %s972_s29  ;;  %p1605_p9 = scmp.ne.s32.totalorder %s1603_s4, 0 }
  0x80   : > { %760 = vmatprep.mubr.msk.bf16.mxu0 %vm1161_vm0, %v1160_v0  ;;  %s976_s24 = sshll.u32 %s1164_s25, 4  ;;  %s977_s24 = int_to_ptr.vmem [resolvable:$false] %s976_s24 }
  0x81   : > { %s1452_s5 = scalar_lea.hbm %s1604_s30, %s730_s9  ;;  %p974_p2 = pnand %p973_p7, %p1605_p9 }
  0x82   : > { %s978_s12 = scalar_lea.vmem %s977_s24, 128  ;;  %p979_p10 = scmp.lt.s32.totalorder %s551_s7, %s977_s24 }
  0x83   : > { %p975_p3 = pneg %p974_p2  ;;  %p980_p6 = scmp.lt.s32.totalorder %s978_s12, %s972_s29 }
  0x85   : > { %p981_p8 = por %p980_p6, %p979_p10 }
  0x87   : > { %p982_p0 = pnand %p981_p8, %p975_p3 }
 0x152   : > { %v372_v5 = vpop.f32.mrb[0].mxu0 }
 0x153   : > { %v373_v6 = vadd.f32 %v720_v4, %v372_v5  ;;  %v750_v7 = vpop.f32.mrb[1].mxu0 }
 0x154   : > { %v375_v8 = vpop.f32.mrb[2].mxu0 }
 0x155   : > { %v378_v9 = vpack.c.bf16 %v373_v6, %v373_v6  ;;  %v751_v10 = vpop.f32.mrb[3].mxu0 }
 0x157   : > { %380 = vst.msk [vmem:[#allocation2] sm:$0xf] %vm379_vm2, %v378_v9  ;;  %384 = vrot.lane.b32.xlu0 %v378_v9, %s1162_s18 }
 0x15e   : > { %v397_v14 = vld [vmem:[#allocation2] sm:$0xf] }
 0x1c9   : > { %v385_v11 = vpop.permute.xlu0 %384 }
 0x1ca   : > { %387 = vst.msk [vmem:[#allocation3] sm:$0xf] %vm379_vm2, %v385_v11 }
 0x1d1   : > { %v398_v12 = vld [vmem:[#allocation3] sm:$0xf] }
 0x1d2   : > { %v404_v13 = vsel %vm399_vm3, %v398_v12, 0 }
 0x1d3   : > { %753 = vmatpush3.bf16.xpose.msra.mxu1 %v404_v13 }
 0x1da   : > { %755 = vmatmul.mubr.msk.bf16.vlgmr.msra.gmra.mrb[0].mxu1 %vm399_vm3, %v397_v14 }
 0x2ad   : > { %v440_v15 = vpop.f32.mrb[0].mxu1 }
 0x2ae   : > { %v756_v16 = vpop.f32.mrb[1].mxu1  ;;  %v447_v17 = vsel %vm446_vm4, %v440_v15, -inf }
 0x2af   : > { %448 = vmax.xlane.f32.xlu0 %v447_v17  ;;  %v443_v18 = vpop.f32.mrb[2].mxu1 }
 0x2b0   : > { %v757_v19 = vpop.f32.mrb[3].mxu1 }
 0x33c   : > { %v449_v20 = vpop.xlane.xlu0 %448 }
 0x33d   : > { %v450_v21 = vsub.f32 %v440_v15, %v449_v20 }
 0x33f   : > { %v451_v22 = vmul.f32 1.442695, %v450_v21 }
 0x341   : > { %908 = vpow2.f32 %v451_v22 }
 0x34b   : > { %v909_v23 = vpop.eup %908 }
 0x34c   : > { %v453_v24 = vsel %vm446_vm4, %v909_v23, 0.0 }
 0x34d   : > { %454 = vadd.xlane.f32.xlu1 %v453_v24 }
 0x35e   : > { %388 = vrot.lane.b32.xlu1 %v378_v9, %s1163_s6 }
 0x3da   : > { %v455_v25 = vpop.xlane.xlu1 %454 }
 0x3db   : > { %910 = vrcp.f32 %v455_v25 }
 0x3de   : > { %v389_v26 = vpop.permute.xlu1 %388 }
 0x3df   : > { %391 = vst.msk [vmem:[#allocation4] sm:$0xf] %vm379_vm2, %v389_v26 }
 0x3e5   : > { %v911_v27 = vpop.eup %910 }
 0x3e6   : > { %v457_v28 = vmul.f32 %v911_v27, %v909_v23  ;;  %v461_v29 = vld [vmem:[#allocation4] sm:$0xf] }
 0x3e7   : > { %v467_v30 = vsel %vm465_vm5, %v461_v29, 0 }
 0x3e8   : > { %759 = vmatpush3.bf16.msra.mxu0 %v467_v30  ;;  %v458_v31 = vpack.c.bf16 %v457_v28, %v457_v28 }
 0x3ea   : > { %460 = vst.msk [vmem:[%s301_s10] sm:$0xf] %vm459_vm6, %v458_v31 }
 0x3eb   : > { %761 = vmatmul.mubr.msk.bf16.vlgmr.msra.gmra.mrb[4].mxu0 %vm446_vm4, %v458_v31 }
 0x3ec   : > { %985 = shalt.err (!%p982_p0)
}
 0x3ed   : > { %s986_s18 = scalar_lea.hbm %s1452_s5, 64  ;;  %s990_s11 = scalar_lea.hbm %s1604_s30, 256 }
 0x3ee   : > { %p987_p4 = scmp.ne.s32.totalorder %s1452_s5, %s986_s18  ;;  %p991_p12 = scmp.lt.u32.totalorder %s1452_s5, %s1604_s30 }
 0x3ef   : > { %p992_p5 = scmp.lt.u32.totalorder %s990_s11, %s986_s18  ;;  %p994_p7 = scmp.lt.u32.totalorder %s986_s18, %s1452_s5 }
 0x3f0   : > { %p988_p11 = pnand %p987_p4, %p1605_p9 }
 0x3f1   : > { %p993_p13 = por %p992_p5, %p991_p12 }
 0x3f2   : > { %p989_p1 = pneg %p988_p11 }
 0x3f3   : > { %p995_p2 = por %p994_p7, %p993_p13 }
 0x3f5   : > { %p996_p3 = pnand %p995_p2, %p989_p1 }
 0x3f7   : > { %999 = shalt.err (!%p996_p3)
}
 0x3f8   : > { %769 = dma.vmem_to_hbm [thread:$0]  (%p1605_p9), %s551_s7, 64, %s1452_s5, %s518_s8  }
 0x3f9   : > { %s294_s29 = scalar_lea.vmem [#allocation10], %s718_s14  ;;  %s1606_s18 = sld [smem:[#allocation25_spill]] }
 0x3fa   : > { %s534_s25 = sshll.u32 %s294_s29, 4  ;;  %s513_s14 = scalar_lea.sflag [#allocation7], %s1436_s21  ;;  %s1481_s25 = int_to_ptr.vmem [resolvable:$true] %s534_s25 }
 0x3fb   : > { %s1000_s5 = scalar_lea.vmem %s1481_s25, 64  ;;  %s1165_s3 = smov [#allocation10]  }
 0x3fc   : > { %p1001_p10 = scmp.ne.s32.totalorder %s1481_s25, %s1000_s5  ;;  %s1004_s7 = sshll.u32 %s1165_s3, 4  ;;  %s1005_s7 = int_to_ptr.vmem [resolvable:$false] %s1004_s7 }
 0x3fd   : > { %p1007_p0 = scmp.lt.s32.totalorder %s1481_s25, %s1005_s7 }
 0x3fe   : > { %p1002_p6 = pnand %p1001_p10, %p1605_p9 }
 0x3ff   : > { %s1607_s6 = smov %s1606_s18  ;;  %s1479_s10 = scalar_lea.hbm %s1606_s18, %s730_s9 }
 0x400   : > { %p1003_p8 = pneg %p1002_p6  ;;  %s1006_s9 = scalar_lea.vmem %s1005_s7, 128 }
 0x401   : > { %p1008_p4 = scmp.lt.s32.totalorder %s1006_s9, %s1000_s5 }
 0x403   : > { %p1009_p11 = por %p1008_p4, %p1007_p0 }
 0x405   : > { %p1010_p1 = pnand %p1009_p11, %p1003_p8 }
 0x4be   : > { %v503_v32 = vpop.f32.mrb[4].mxu0 }
 0x4bf   : > { %v509_v33 = vpack.c.bf16 %v503_v32, %v503_v32  ;;  %v762_v34 = vpop.f32.mrb[5].mxu0 }
 0x4c0   : > { %v506_v35 = vpop.f32.mrb[6].mxu0 }
 0x4c1   : > { %v763_v36 = vpop.f32.mrb[7].mxu0  ;;  %511 = vst.msk [vmem:[%s294_s29] sm:$0xf] %vm379_vm2, %v509_v33 }
 0x4c2   : > { %1013 = shalt.err (!%p1010_p1)
}
 0x4c3   : > { %s1014_s21 = scalar_lea.hbm %s1479_s10, 64  ;;  %s1018_s27 = scalar_lea.hbm %s1607_s6, 256 }
 0x4c4   : > { %p1015_p12 = scmp.ne.s32.totalorder %s1479_s10, %s1014_s21  ;;  %p1019_p7 = scmp.lt.u32.totalorder %s1479_s10, %s1607_s6 }
 0x4c5   : > { %p1020_p2 = scmp.lt.u32.totalorder %s1018_s27, %s1014_s21  ;;  %p1022_p10 = scmp.lt.u32.totalorder %s1014_s21, %s1479_s10 }
 0x4c6   : > { %p1016_p5 = pnand %p1015_p12, %p1605_p9 }
 0x4c7   : > { %p1021_p3 = por %p1020_p2, %p1019_p7 }
 0x4c8   : > { %p1017_p13 = pneg %p1016_p5 }
 0x4c9   : > { %p1023_p6 = por %p1022_p10, %p1021_p3 }
 0x4cb   : > { %p1024_p8 = pnand %p1023_p6, %p1017_p13 }
 0x4cd   : > { %1027 = shalt.err (!%p1024_p8)
}
 0x4ce   : > { %768 = dma.vmem_to_hbm [thread:$0]  (%p1605_p9), %s1481_s25, 64, %s1479_s10, %s513_s14  }
 0x4cf PF: > { %s1608_s24 = sld [smem:[#allocation19_spill]]  ;;  %s1609_s12 = sld [smem:[#allocation17_spill]] }
 0x4d0   : > { %p1610_p4 = scmp.ne.s32.totalorder %s1598_s0, 0 }
 0x4d5   : > { %p787_p0 = scmp.ge.s32.totalorder %s1608_s24, 2  ;;  %s562_s18 = sand.u32 1, %s1609_s12  }
 0x4d6   : > { %s563_s5 = scalar_lea.sflag [#allocation7], %s562_s18 }
 0x4d7   : > { %p780_p11 = pnand %p787_p0, %p1610_p4 }
 0x4d9   : > { %1093 = dma.done.wait (!%p780_p11), %s563_s5, 64  }
 0x4da   : > { %1095 = vsyncadd (!%p780_p11), %s563_s5, 4294967232  ;;  %s572_s3 = scalar_lea.sflag [#allocation12], %s562_s18 }
 0x4db   : > { %1097 = dma.done.wait (!%p780_p11), %s572_s3, 64  }
 0x4dc   : > { %1099 = vsyncadd (!%p780_p11), %s572_s3, 4294967232  ;;  %s27_s28 = sadd.s32 1, %s1608_s24   ;;  %s1612_s25 = sld [smem:[#allocation23_spill]] }
 0x4dd   : > { %p1511_p1 = scmp.ge.s32.totalorder %s27_s28, 6   ;;  %s1613_s0 = smov %s1372_s15 }
 0x4de   : > { %s1614_s10 = sld [smem:[#allocation18_spill]]  ;;  %s1615_s14 = sld [smem:[#allocation20_spill]] }
 0x4df   : > { %s1616_s27 = sld [smem:[#allocation22_spill]]  ;;  %s1617_s15 = smov %s1106_s16 }
 0x4e0   : > { %s1618_s16 = smov %s1110_s17  ;;  %s1619_s17 = smov %s1375_s13 }
 0x4e1   : > { %s1620_s18 = smov %s1118_s19  ;;  %s1621_s19 = smov %s1122_s20 }
 0x4e2   : > { %s1622_s20 = smov %s1612_s25  ;;  %s1623_s21 = smov %s1130_s22 }
 0x4e3   : > { %s1624_s22 = smov %s1134_s23  ;;  %s1625_s23 = smov %s1613_s0 }
 0x4e4   : > { %s1626_s24 = smov %s1146_s26  ;;  %s1627_s25 = smov %s1614_s10 }
 0x4e5   : > { %s1628_s26 = smov %s1615_s14  ;;  %26 = sbr.rel (!%p1511_p1) target bundleno = 18 (0x12), region = 115 }
 0x4ec   :  { %577 = vsyncpa [#allocation6], 1 }
 0x4ed   :  { %579 = vsyncpa [#allocation6 + $0x1], 1 }
 0x4ee   :  { %580 = vsyncpa [#allocation9], 1 }
 0x4ef   :  { %582 = vsyncpa [#allocation9 + $0x1], 1 }
 0x4f0   :  { %583 = vsyncpa [#allocation7], 1 }
 0x4f1   :  { %585 = vsyncpa [#allocation7 + $0x1], 1 }
 0x4f2   :  { %586 = vsyncpa [#allocation12], 1 }
 0x4f3   :  { %588 = vsyncpa [#allocation12 + $0x1], 1 }

</bundles_post_ra>
